<compile_context>
chip_gen: v7x
topology: tpu7x:2x2x1
jax: 0.10.0
libtpu: 0.0.40
codegen_flags: <defaults>
</compile_context>

<pallas_src>
import functools

import jax
import jax.numpy as jnp
from jax.experimental import pallas as pl
from jax.experimental.pallas import tpu as pltpu


_LANE = 128
_INPUT_TILE_BUDGET = 8 * 1024 * 1024  # bytes per (single-buffered) input tile


def _sublane_pack(itemsize):
    # Sublane packing factor per 32-bit word for the dtype.
    return {4: 8, 2: 16, 1: 32}.get(itemsize, 8)


def _baseline_onestep_kernel(x_ref, o_ref, *, lane):
    # x_ref: (Bb, Tt, Fw) VMEM tile -- Fw is a 128-lane window (or the full
    #        F axis when F < 128) containing the label column at static `lane`.
    # o_ref: (Bb, Tt) lane-dense VMEM tile (time on lanes).
    # The lane-select + sublane->lane relayout runs on the XLU and is fully
    # hidden under the input DMA (this kernel is input-HBM-bound).
    o_ref[...] = x_ref[:, :, lane]


def _choose_blocks(B, T, F, itemsize, label_index):
    """Pick (Bb, Tt, Fw, f_block, lane) tile parameters."""
    sub = _sublane_pack(itemsize)

    # Feature window: a single 128-lane window whenever F >= 128 (Pallas pads
    # a partial trailing block; we never touch pad lanes), otherwise the full
    # (small) feature axis.
    if F >= _LANE:
        fw, f_block, lane = _LANE, label_index // _LANE, label_index % _LANE
    else:
        fw, f_block, lane = F, 0, label_index

    row_bytes = fw * itemsize

    # Time block: multiple of 128 (unmasked, lane-dense output stores), sized
    # so `sub` batch rows fit the tile budget, never larger than T.
    if T >= _LANE:
        tt_budget = _INPUT_TILE_BUDGET // (sub * row_bytes)
        tt = max(_LANE, (tt_budget // _LANE) * _LANE)
        tt = min(tt, (T // _LANE) * _LANE)
    else:
        tt = T

    # Batch block: fill the remaining budget, aligned to the sublane pack,
    # falling back to the full batch (never a giant unaligned tile).
    cap = max(1, _INPUT_TILE_BUDGET // (tt * row_bytes))
    if cap >= B:
        bb = B
    else:
        bb = max(sub, (cap // sub) * sub)
        bb = min(bb, B)

    # Guarantee >= 2 grid steps when the shape allows so v7x's two TensorCores
    # both get work.  Prefer splitting T (keeps the output lane-dense); only
    # split B if T cannot be split.  Tiny shapes stay single-step.
    def _steps(bb_, tt_):
        return pl.cdiv(B, bb_) * pl.cdiv(T, tt_)

    if _steps(bb, tt) < 2:
        if tt >= 2 * _LANE and tt % _LANE == 0:
            tt = max(_LANE, ((tt // 2) // _LANE) * _LANE)
        elif bb >= 2 * sub:
            bb = max(sub, ((bb // 2) // sub) * sub)

    return bb, tt, fw, f_block, lane


def baseline_onestep(inputs, label_index=None):
    """Pallas equivalent of Baseline_onestep.forward.

    inputs: (B, T, F) array.
    Returns `inputs` unchanged if label_index is None, otherwise the
    (B, T, 1) slice of feature `label_index`.
    """
    if label_index is None:
        # PyTorch module returns the input tensor untouched.
        return inputs

    B, T, F = inputs.shape

    # label_index must be a static Python int (baked into the kernel).
    label_index = int(label_index)
    if not -F <= label_index < F:
        raise ValueError(f"label_index {label_index} out of range for F={F}")
    label_index %= F  # normalize negative indices (PyTorch-legal)

    itemsize = jnp.dtype(inputs.dtype).itemsize
    Bb, Tt, Fw, f_block, lane = _choose_blocks(B, T, F, itemsize, label_index)

    # Explicit scoped-VMEM limit: double-buffered input + output tiles plus
    # slack; >= 32 MiB (raises v5e's 16 MiB default), <= 48 MiB (v7x has only
    # 64 MiB physical VMEM).
    in_tile = Bb * Tt * Fw * itemsize
    out_tile = Bb * Tt * itemsize
    vmem_limit = 2 * (in_tile + out_tile) + (4 << 20)
    vmem_limit = int(max(min(vmem_limit, 48 << 20), 32 << 20))

    kernel = functools.partial(_baseline_onestep_kernel, lane=lane)

    out2d = pl.pallas_call(
        kernel,
        out_shape=jax.ShapeDtypeStruct((B, T), inputs.dtype),
        grid=(pl.cdiv(B, Bb), pl.cdiv(T, Tt)),
        in_specs=[pl.BlockSpec((Bb, Tt, Fw), lambda b, t: (b, t, f_block))],
        out_specs=pl.BlockSpec((Bb, Tt), lambda b, t: (b, t)),
        compiler_params=pltpu.CompilerParams(
            dimension_semantics=("parallel", "parallel"),
            vmem_limit_bytes=vmem_limit),
    )(inputs)

    # Free metadata reshape to match the PyTorch output shape (B, T, 1).
    return out2d[:, :, None]


if __name__ == "__main__":
    key = jax.random.PRNGKey(0)
    k1, k2, k3 = jax.random.split(key, 3)

    # Small shape: F < 128 path (full-F window), whole batch in one tile.
    B, T, F = 2, 8, 16
    label_index = 3
    x = jax.random.normal(k1, (B, T, F), dtype=jnp.float32)

    out = jax.block_until_ready(baseline_onestep(x, label_index=label_index))
    assert out.shape == (B, T, 1), out.shape
    assert jnp.array_equal(out, x[:, :, label_index][:, :, None])

    # Negative label_index (PyTorch-legal) must pick the last feature.
    out_neg = jax.block_until_ready(baseline_onestep(x, label_index=-1))
    assert jnp.array_equal(out_neg, x[:, :, -1][:, :, None])

    # Lane-aligned F and T: 128-lane-window input + lane-dense output path.
    x2 = jax.random.normal(k2, (4, 128, 256), dtype=jnp.float32)
    out2 = jax.block_until_ready(baseline_onestep(x2, label_index=200))
    assert out2.shape == (4, 128, 1)
    assert jnp.array_equal(out2, x2[:, :, 200][:, :, None])

    # Unaligned F >= 128 (label column sits in a padded partial feature block)
    # and unaligned T (partial trailing time block) -- the new fast path.
    x3 = jax.random.normal(k3, (3, 200, 200), dtype=jnp.float32)
    out3 = jax.block_until_ready(baseline_onestep(x3, label_index=150))
    assert out3.shape == (3, 200, 1)
    assert jnp.array_equal(out3, x3[:, :, 150][:, :, None])

    # label_index=None path is the identity, as in the PyTorch module.
    out_id = jax.block_until_ready(baseline_onestep(x, label_index=None))
    assert out_id.shape == x.shape
    assert jnp.array_equal(out_id, x)

    print("KERNEL_OK")
</pallas_src>

<mosaic_0001>
module attributes {stable_mosaic.version = 11 : i64} {
  func.func @_baseline_onestep_kernel(%arg0: i32, %arg1: i32, %arg2: memref<2x8x16xf32, #tpu.memory_space<vmem>>, %arg3: memref<2x8xf32, #tpu.memory_space<vmem>>) attributes {dimension_semantics = [#tpu.dimension_semantics<parallel>, #tpu.dimension_semantics<parallel>], iteration_bounds = array<i64: 1, 1>, scalar_prefetch = 0 : i64, scratch_operands = 0 : i64, tpu.core_type = #tpu.core_type<tc>, window_params = [{transform_indices = @transform_0, window_bounds = array<i64: 2, 8, 16>}, {transform_indices = @transform_1, window_bounds = array<i64: 2, 8>}]} {
    %c0 = arith.constant 0 : index
    %c0_0 = arith.constant 0 : index
    %c3 = arith.constant 3 : index
    %0 = vector.load %arg2[%c0, %c0_0, %c3] : memref<2x8x16xf32, #tpu.memory_space<vmem>>, vector<2x8x1xf32>
    %1 = vector.shape_cast %0 : vector<2x8x1xf32> to vector<2x8xf32>
    %c0_1 = arith.constant 0 : index
    %c0_2 = arith.constant 0 : index
    %2 = vector.load %arg3[%c0_1, %c0_2] : memref<2x8xf32, #tpu.memory_space<vmem>>, vector<2x8xf32>
    tpu.vector_store %arg3[%c0_1, %c0_2], %1 {strides = array<i32>} : memref<2x8xf32, #tpu.memory_space<vmem>>, vector<2x8xf32>,
    return
  }
  func.func @transform_0(%arg0: i32, %arg1: i32) -> (i32, i32, i32) {
    %c0_i32 = arith.constant 0 : i32
    %c0_i32_0 = arith.constant 0 : i32
    return %arg0, %arg1, %c0_i32 : i32, i32, i32
  }
  func.func @transform_1(%arg0: i32, %arg1: i32) -> (i32, i32) {
    %c0_i32 = arith.constant 0 : i32
    return %arg0, %arg1 : i32, i32
  }
}

</mosaic_0001>

<bundles_post_ra>
// kernel: tpu_custom_call.1
= control target key start
LH: loop header
LB: loop body
LE: loop exit
PB: predicated region body
PF: predicated region fallthrough
CT: control target
= control target key end

     0   :  { %6 = vsyncpa [#allocation3], 0  ;;  %s156_s0 = inlined_call_operand.hbm [shape: f32[2,8,16], index: 0, kind: input, shape index: {}]   ;;  %s157_s1 = inlined_call_operand.hbm [shape: f32[2,8], index: 1, kind: output, shape index: {}]  }
   0x1   :  { %7 = vsyncpa [#allocation4], 0  ;;  %s117_s6 = smov [#allocation2]   ;;  %s69_s10 = scalar_lea.hbm %s156_s0, 256 }
   0x2   :  { %s13_s7 = sshll.u32 %s117_s6, 4  ;;  %p70_p0 = scmp.ne.s32.totalorder %s156_s0, %s69_s10  ;;  %s14_s7 = int_to_ptr.vmem [resolvable:$true] %s13_s7 }
   0x3   :  { %p73_p1 = scmp.lt.u32.totalorder %s69_s10, %s156_s0 }
   0x5   :  { %p75_p2 = pnand %p73_p1, %p70_p0 }
   0x7   :  { %78 = shalt.err (!%p75_p2)
}
   0x8   :  { %s79_s15 = scalar_lea.vmem %s14_s7, 256  ;;  %p84_p4 = scmp.lt.s32.totalorder %s14_s7, %s14_s7 }
   0x9   :  { %p80_p3 = scmp.ne.s32.totalorder %s14_s7, %s79_s15  ;;  %p85_p5 = scmp.lt.s32.totalorder %s79_s15, %s79_s15 }
   0xb   :  { %p86_p6 = por %p85_p5, %p84_p4 }
   0xd   :  { %p87_p7 = pnand %p86_p6, %p80_p3 }
   0xf   :  { %90 = shalt.err (!%p87_p7)
}
  0x10   :  { %s118_s16 = smov 128   ;;  %s119_s17 = smov 8  }
  0x11   :  { %19 = dma.hbm_to_vmem [thread:$0]  %s156_s0, 256, %s14_s7, [#allocation3], %s118_s16, %s118_s16, %s119_s17  }
  0x12   :  { %113 = dma.done.wait [#allocation3], 256  }
  0x13   :  { %114 = vsyncadd [#allocation3], 4294967040  ;;  %v120_v0 = vmov 3   ;;  %v23_v1 = vld [vmem:[#allocation2] sm:$0xff]  ;;  %v24_v2 = vld [vmem:[#allocation2 + $0x8] sm:$0xff]  ;;  %v33_v3 = vlaneseq  ;;  %s121_s20 = smov [#allocation5]  }
  0x14   :  { %68 = vset.pattern.permute.xlu0 %v120_v0  ;;  %s54_s21 = sshll.u32 %s121_s20, 4  ;;  %vm43_vm0 = vcmask 1041409   ;;  %vm46_vm1 = vcmask 58368   ;;  %s55_s21 = int_to_ptr.vmem [resolvable:$true] %s54_s21 }
  0x15   :  { %28 = vperm.xlu0 %68, %v23_v1   ;;  %v34_v4 = vand.u32 127, %v33_v3  ;;  %v36_v5 = vshrl.u32 %v33_v3, 7  ;;  %s91_s0 = scalar_lea.vmem %s55_s21, 32  ;;  %p96_p9 = scmp.lt.s32.totalorder %s55_s21, %s55_s21 }
  0x16   :  { %p92_p8 = scmp.ne.s32.totalorder %s55_s21, %s91_s0  ;;  %p97_p10 = scmp.lt.s32.totalorder %s91_s0, %s91_s0 }
  0x17   :  { %v37_v7 = vsub.s32 %v34_v4, %v36_v5 }
  0x18   :  { %p98_p11 = por %p97_p10, %p96_p9 }
  0x19   :  { %31 = vperm.xlu0 %68, %v24_v2  }
  0x1a   :  { %p99_p12 = pnand %p98_p11, %p92_p8 }
  0x94   :  { %v29_v6 = vpop.permute.xlu0 %28 }
  0x95   :  { %v38_v9 = vrot.slane %v29_v6, %v37_v7 }
  0x98   :  { %v32_v8 = vpop.permute.xlu0 %31 }
  0x99   :  { %v42_v10 = vrot.slane %v32_v8, %v37_v7 }
  0x9b   :  { %v44_v11 = vsel %vm43_vm0, %v42_v10, %v38_v9 }
  0x9c   :  { %47 = vst.msk [vmem:[#allocation5] sm:$0x3] %vm46_vm1, %v44_v11 }
  0x9d   :  { %102 = shalt.err (!%p99_p12)
}
  0x9e   :  { %s103_s24 = scalar_lea.hbm %s157_s1, 32 }
  0x9f   :  { %p104_p13 = scmp.ne.s32.totalorder %s157_s1, %s103_s24  ;;  %p107_p0 = scmp.lt.u32.totalorder %s103_s24, %s157_s1 }
  0xa1   :  { %p109_p1 = pnand %p107_p0, %p104_p13 }
  0xa3   :  { %112 = shalt.err (!%p109_p1)
}
  0xa4   :  { %57 = dma.vmem_to_hbm [thread:$0]  %s55_s21, 32, %s157_s1, [#allocation4]  }
  0xa5   :  { %115 = dma.done.wait [#allocation4], 32  }
  0xa6   :  { %116 = vsyncadd [#allocation4], 4294967264 }
  0xa7   :  { %61 = vsyncpa [#allocation3], 1 }
  0xa8   :  { %62 = vsyncpa [#allocation4], 1 }

</bundles_post_ra>
